<compile_context>
chip_gen: v5e
topology: v5e:2x2
jax: 0.10.0
libtpu: 0.0.40
codegen_flags: <defaults>
</compile_context>

<pallas_src>
import math
import jax
import jax.numpy as jnp
from jax.experimental import pallas as pl
from jax.experimental.pallas import tpu as pltpu

# ---------------- configuration (what the ViT MLP forward implies) ----------------
D_MODEL = 32
D_INTER = 64
BATCH = 4
SEQ = 128          # B*S = 512 tokens per call (review: amortize fixed launch cost)
TM = 128           # rows per grid block


# ---------------- in-kernel math helpers ----------------
def _erf(z):
    # Abramowitz-Stegun 7.1.26 rational approx (|err| ~ 1.5e-7) built only from
    # ops that lower cleanly in Mosaic.  Divide replaced by EUP approx reciprocal.
    a1, a2, a3, a4, a5 = 0.254829592, -0.284496736, 1.421413741, -1.453152027, 1.061405429
    pcoef = 0.3275911
    az = jnp.abs(z)
    t = pl.reciprocal(1.0 + pcoef * az, approx=True)
    poly = ((((a5 * t + a4) * t + a3) * t + a2) * t + a1) * t
    y = 1.0 - poly * jnp.exp(-az * az)
    return jnp.where(z < 0, -y, y)


def _gelu(x):
    # exact (erf-based) GELU, matching torch.nn.GELU() default
    return 0.5 * x * (1.0 + _erf(x * 0.7071067811865476))


# ---------------- fused MLP kernel: mlp1 -> GELU -> mlp2 ----------------
def _mlp_kernel(x_ref, w1_ref, w2_ref, b_ref, o_ref):
    # x_ref : (TM, D)  bf16      w1_ref: (D, DI) bf16     w2_ref: (DI, D) bf16
    # b_ref : (2, DI)  f32  (row 0 = b1, row 1[:D] = b2)
    # o_ref : (TM, D)  f32
    d_out = o_ref.shape[-1]
    h = jnp.dot(x_ref[...], w1_ref[...], preferred_element_type=jnp.float32)
    h = _gelu(h + b_ref[0:1, :])                                   # f32 elementwise
    y = jnp.dot(h.astype(w2_ref.dtype), w2_ref[...],
                preferred_element_type=jnp.float32)
    o_ref[...] = y + b_ref[1:2, :d_out]


def mlp_forward(x, params, *, tm=TM):
    """x: (B, S, d_model) float32 -> (B, S, d_model) float32."""
    B, S, D = x.shape
    DI = params["w1_t"].shape[1]
    M = B * S
    x2 = x.reshape(M, D).astype(jnp.bfloat16)       # flatten tokens; bf16 operands

    # pad token count up to a multiple of the row tile (no-op for M=512, tm=128)
    Mp = pl.cdiv(M, tm) * tm
    if Mp != M:
        x2 = jnp.pad(x2, ((0, Mp - M), (0, 0)))

    out = pl.pallas_call(
        _mlp_kernel,
        out_shape=jax.ShapeDtypeStruct((Mp, D), jnp.float32),
        grid_spec=pltpu.PrefetchScalarGridSpec(
            num_scalar_prefetch=0,
            grid=(Mp // tm,),
            in_specs=[
                pl.BlockSpec((tm, D), lambda i: (i, 0)),   # x rows: tiled over grid
                pl.BlockSpec((D, DI), lambda i: (0, 0)),   # w1_t: resident
                pl.BlockSpec((DI, D), lambda i: (0, 0)),   # w2_t: resident
                pl.BlockSpec((2, DI), lambda i: (0, 0)),   # packed biases: resident
            ],
            out_specs=pl.BlockSpec((tm, D), lambda i: (i, 0)),
        ),
        compiler_params=pltpu.CompilerParams(
            dimension_semantics=("parallel",),             # shard rows across TCs (v7x)
            vmem_limit_bytes=32 * 1024 * 1024,
        ),
    )(x2, params["w1_t"], params["w2_t"], params["b_packed"])

    if Mp != M:
        out = out[:M]
    return out.reshape(B, S, D)


# ---------------- deterministic synthetic parameters (nn.Linear default init) ----------------
def _uniform(key, shape, bound):
    return jax.random.uniform(key, shape, jnp.float32, -bound, bound)


def init_params(key):
    k1, k2, k3, k4 = jax.random.split(key, 4)
    bnd_d = 1.0 / math.sqrt(D_MODEL)
    bnd_i = 1.0 / math.sqrt(D_INTER)
    # mlp1: Linear(d_model -> d_intermediate): weight (DI, D), bias (DI,)
    w1 = _uniform(k1, (D_INTER, D_MODEL), bnd_d)
    b1 = _uniform(k2, (D_INTER,), bnd_d)
    # mlp2: Linear(d_intermediate -> d_model): weight (D, DI), bias (D,)
    w2 = _uniform(k3, (D_MODEL, D_INTER), bnd_i)
    b2 = _uniform(k4, (D_MODEL,), bnd_i)

    b_packed = jnp.zeros((2, D_INTER), jnp.float32)
    b_packed = b_packed.at[0, :].set(b1)
    b_packed = b_packed.at[1, :D_MODEL].set(b2)

    kernel_params = dict(
        w1_t=jnp.transpose(w1).astype(jnp.bfloat16),   # (D, DI), (in, out) layout
        w2_t=jnp.transpose(w2).astype(jnp.bfloat16),   # (DI, D)
        b_packed=b_packed,                             # (2, DI) f32
    )
    ref_params = dict(w1=w1, b1=b1, w2=w2, b2=b2)      # full-precision, for the reference
    return kernel_params, ref_params


def _reference(x, ref_params):
    # pure-JAX f32 reference of the torch module's math
    h = jnp.einsum("bsd,id->bsi", x, ref_params["w1"]) + ref_params["b1"]
    h = 0.5 * h * (1.0 + jax.scipy.special.erf(h * 0.7071067811865476))
    return jnp.einsum("bsi,di->bsd", h, ref_params["w2"]) + ref_params["b2"]


if __name__ == "__main__":
    key = jax.random.PRNGKey(0)
    k_x, k_p = jax.random.split(key)
    x = jax.random.normal(k_x, (BATCH, SEQ, D_MODEL), jnp.float32)
    kernel_params, ref_params = init_params(k_p)

    out = mlp_forward(x, kernel_params)
    out = jax.block_until_ready(out)

    assert out.shape == (BATCH, SEQ, D_MODEL), out.shape
    assert bool(jnp.all(jnp.isfinite(out)))
    ref = _reference(x, ref_params)
    # bf16 matmul operands (f32 accumulation) -> relaxed tolerance vs. f32 reference
    err = float(jnp.max(jnp.abs(out - ref)))
    assert err < 5e-2, err
    print("KERNEL_OK")
</pallas_src>

<mosaic_0001>
module attributes {stable_mosaic.version = 11 : i64} {
  func.func @_mlp_kernel(%arg0: i32, %arg1: memref<128x32xbf16, #tpu.memory_space<vmem>>, %arg2: memref<32x64xbf16, #tpu.memory_space<vmem>>, %arg3: memref<64x32xbf16, #tpu.memory_space<vmem>>, %arg4: memref<2x64xf32, #tpu.memory_space<vmem>>, %arg5: memref<128x32xf32, #tpu.memory_space<vmem>>) attributes {dimension_semantics = [#tpu.dimension_semantics<parallel>], iteration_bounds = array<i64: 4>, scalar_prefetch = 0 : i64, scratch_operands = 0 : i64, tpu.core_type = #tpu.core_type<tc>, window_params = [{transform_indices = @transform_0, window_bounds = array<i64: 128, 32>}, {pipeline_mode = #tpu.pipeline_mode<synchronous>, transform_indices = @transform_1, window_bounds = array<i64: 32, 64>}, {pipeline_mode = #tpu.pipeline_mode<synchronous>, transform_indices = @transform_2, window_bounds = array<i64: 64, 32>}, {pipeline_mode = #tpu.pipeline_mode<synchronous>, transform_indices = @transform_3, window_bounds = array<i64: 2, 64>}, {transform_indices = @transform_4, window_bounds = array<i64: 128, 32>}]} {
    %c0 = arith.constant 0 : index
    %c0_0 = arith.constant 0 : index
    %0 = vector.load %arg1[%c0, %c0_0] : memref<128x32xbf16, #tpu.memory_space<vmem>>, vector<128x32xbf16>
    %c0_1 = arith.constant 0 : index
    %c0_2 = arith.constant 0 : index
    %1 = vector.load %arg2[%c0_1, %c0_2] : memref<32x64xbf16, #tpu.memory_space<vmem>>, vector<32x64xbf16>
    %cst = arith.constant dense<0.000000e+00> : vector<128x64xf32>
    %2 = tpu.matmul %0, %1, %cst {dimension_numbers = #tpu.dot_dimension_numbers<[1], [0], [0], [1], [0, 0, 1, 1], [], []>} : vector<128x32xbf16>, vector<32x64xbf16>, vector<128x64xf32> -> vector<128x64xf32>
    %c0_3 = arith.constant 0 : index
    %c0_4 = arith.constant 0 : index
    %3 = vector.load %arg4[%c0_3, %c0_4] : memref<2x64xf32, #tpu.memory_space<vmem>>, vector<1x64xf32>
    %4 = vector.broadcast %3 : vector<1x64xf32> to vector<128x64xf32>
    %5 = arith.addf %2, %4 : vector<128x64xf32>
    %cst_5 = arith.constant 5.000000e-01 : f32
    %6 = vector.broadcast %cst_5 : f32 to vector<128x64xf32>
    %7 = arith.mulf %6, %5 : vector<128x64xf32>
    %cst_6 = arith.constant 0.707106769 : f32
    %8 = vector.broadcast %cst_6 : f32 to vector<128x64xf32>
    %9 = arith.mulf %5, %8 : vector<128x64xf32>
    %10 = math.absf %9 : vector<128x64xf32>
    %cst_7 = arith.constant 0.327591091 : f32
    %11 = vector.broadcast %cst_7 : f32 to vector<128x64xf32>
    %12 = arith.mulf %11, %10 : vector<128x64xf32>
    %cst_8 = arith.constant 1.000000e+00 : f32
    %13 = vector.broadcast %cst_8 : f32 to vector<128x64xf32>
    %14 = arith.addf %13, %12 : vector<128x64xf32>
    %15 = tpu.reciprocal %14 {approx = true} : vector<128x64xf32> -> vector<128x64xf32>
    %cst_9 = arith.constant 1.06140542 : f32
    %16 = vector.broadcast %cst_9 : f32 to vector<128x64xf32>
    %17 = arith.mulf %16, %15 : vector<128x64xf32>
    %cst_10 = arith.constant -1.45315206 : f32
    %18 = vector.broadcast %cst_10 : f32 to vector<128x64xf32>
    %19 = arith.addf %17, %18 : vector<128x64xf32>
    %20 = arith.mulf %19, %15 : vector<128x64xf32>
    %cst_11 = arith.constant 1.42141378 : f32
    %21 = vector.broadcast %cst_11 : f32 to vector<128x64xf32>
    %22 = arith.addf %20, %21 : vector<128x64xf32>
    %23 = arith.mulf %22, %15 : vector<128x64xf32>
    %cst_12 = arith.constant -0.284496725 : f32
    %24 = vector.broadcast %cst_12 : f32 to vector<128x64xf32>
    %25 = arith.addf %23, %24 : vector<128x64xf32>
    %26 = arith.mulf %25, %15 : vector<128x64xf32>
    %cst_13 = arith.constant 0.254829586 : f32
    %27 = vector.broadcast %cst_13 : f32 to vector<128x64xf32>
    %28 = arith.addf %26, %27 : vector<128x64xf32>
    %29 = arith.mulf %28, %15 : vector<128x64xf32>
    %cst_14 = arith.constant 0.000000e+00 : f32
    %30 = vector.broadcast %cst_14 : f32 to vector<128x64xf32>
    %31 = arith.subf %30, %10 : vector<128x64xf32>
    %32 = arith.mulf %31, %10 : vector<128x64xf32>
    %33 = math.exp %32 : vector<128x64xf32>
    %34 = arith.mulf %29, %33 : vector<128x64xf32>
    %cst_15 = arith.constant 1.000000e+00 : f32
    %35 = vector.broadcast %cst_15 : f32 to vector<128x64xf32>
    %36 = arith.subf %35, %34 : vector<128x64xf32>
    %cst_16 = arith.constant 0.000000e+00 : f32
    %37 = vector.broadcast %cst_16 : f32 to vector<128x64xf32>
    %38 = arith.cmpf olt, %9, %37 : vector<128x64xf32>
    %cst_17 = arith.constant 0.000000e+00 : f32
    %39 = vector.broadcast %cst_17 : f32 to vector<128x64xf32>
    %40 = arith.subf %39, %36 : vector<128x64xf32>
    %41 = arith.select %38, %40, %36 : vector<128x64xi1>, vector<128x64xf32>
    %cst_18 = arith.constant 1.000000e+00 : f32
    %42 = vector.broadcast %cst_18 : f32 to vector<128x64xf32>
    %43 = arith.addf %42, %41 : vector<128x64xf32>
    %44 = arith.mulf %7, %43 : vector<128x64xf32>
    %45 = arith.truncf %44 : vector<128x64xf32> to vector<128x64xbf16>
    %c0_19 = arith.constant 0 : index
    %c0_20 = arith.constant 0 : index
    %46 = vector.load %arg3[%c0_19, %c0_20] : memref<64x32xbf16, #tpu.memory_space<vmem>>, vector<64x32xbf16>
    %cst_21 = arith.constant dense<0.000000e+00> : vector<128x32xf32>
    %47 = tpu.matmul %45, %46, %cst_21 {dimension_numbers = #tpu.dot_dimension_numbers<[1], [0], [0], [1], [0, 0, 1, 1], [], []>} : vector<128x64xbf16>, vector<64x32xbf16>, vector<128x32xf32> -> vector<128x32xf32>
    %c1 = arith.constant 1 : index
    %c0_22 = arith.constant 0 : index
    %48 = vector.load %arg4[%c1, %c0_22] : memref<2x64xf32, #tpu.memory_space<vmem>>, vector<1x32xf32>
    %49 = vector.broadcast %48 : vector<1x32xf32> to vector<128x32xf32>
    %50 = arith.addf %47, %49 : vector<128x32xf32>
    %c0_23 = arith.constant 0 : index
    %c0_24 = arith.constant 0 : index
    %51 = vector.load %arg5[%c0_23, %c0_24] : memref<128x32xf32, #tpu.memory_space<vmem>>, vector<128x32xf32>
    tpu.vector_store %arg5[%c0_23, %c0_24], %50 {strides = array<i32>} : memref<128x32xf32, #tpu.memory_space<vmem>>, vector<128x32xf32>,
    return
  }
  func.func @transform_0(%arg0: i32) -> (i32, i32) {
    %c0_i32 = arith.constant 0 : i32
    %c0_i32_0 = arith.constant 0 : i32
    return %arg0, %c0_i32 : i32, i32
  }
  func.func @transform_1(%arg0: i32) -> (i32, i32) {
    %c0_i32 = arith.constant 0 : i32
    %c0_i32_0 = arith.constant 0 : i32
    %c0_i32_1 = arith.constant 0 : i32
    return %c0_i32, %c0_i32_0 : i32, i32
  }
  func.func @transform_2(%arg0: i32) -> (i32, i32) {
    %c0_i32 = arith.constant 0 : i32
    %c0_i32_0 = arith.constant 0 : i32
    %c0_i32_1 = arith.constant 0 : i32
    return %c0_i32, %c0_i32_0 : i32, i32
  }
  func.func @transform_3(%arg0: i32) -> (i32, i32) {
    %c0_i32 = arith.constant 0 : i32
    %c0_i32_0 = arith.constant 0 : i32
    %c0_i32_1 = arith.constant 0 : i32
    return %c0_i32, %c0_i32_0 : i32, i32
  }
  func.func @transform_4(%arg0: i32) -> (i32, i32) {
    %c0_i32 = arith.constant 0 : i32
    %c0_i32_0 = arith.constant 0 : i32
    return %arg0, %c0_i32 : i32, i32
  }
}

</mosaic_0001>

<bundles_post_ra>
// kernel: tpu_custom_call.1
= control target key start
LH: loop header
LB: loop body
LE: loop exit
PB: predicated region body
PF: predicated region fallthrough
CT: control target
= control target key end

     0   :  { %s1164_s15 = smov 0   ;;  %s1606_s0 = inlined_call_operand.vmem [shape: bf16[512,32], index: 0, kind: input, shape index: {}]   ;;  %s1607_s1 = inlined_call_operand.vmem [shape: bf16[32,64], index: 1, kind: input, shape index: {}]   ;;  %s1608_s2 = inlined_call_operand.vmem [shape: bf16[64,32], index: 2, kind: input, shape index: {}]   ;;  %s1609_s3 = inlined_call_operand.vmem [shape: f32[2,64], index: 3, kind: input, shape index: {}]   ;;  %s1610_s4 = inlined_call_operand.vmem [shape: f32[512,32], index: 4, kind: output, shape index: {}]  }
   0x1 LB: > { %s954_s16 = sadd.s32 4294967295, %s1137_s15   ;;  %p958_p0 = scmp.ge.s32.totalorder %s1137_s15, 1  ;;  %s1137_s15 = sphi %s1164_s15, %s14_s15  }
   0x2   : > { %p163_p1 = scmp.lt.s32.totalorder %s1137_s15, 5 }
   0x4   : > { %p164_p2 = pnand %p958_p0, %p163_p1 }
   0x6   : > { %167 = sbr.rel (%p164_p2) target bundleno = 459 (0x1cb), region = 36 }
   0xb   : > { %v1046_v0 = vld [vmem:[%s1607_s1 + $0x8] sm:$0xff]  ;;  %s959_s19 = sshll.u32 %s954_s16, 4  ;;  %v1045_v1 = vld [vmem:[%s1607_s1] sm:$0xff]  ;;  %vm276_vm0 = vcmask 261120   ;;  %v1050_v20 = vld [vmem:[%s1608_s2 + $0x18] sm:$0xff]  ;;  %vm808_vm3 = vcmask 523264  }
   0xc   : > { %p190_p3 = scmp.lt.s32.totalorder %s959_s19, 63  ;;  %307 = vmatpush.bf16.msra.mxu0 %v1046_v0  ;;  %1051 = vmatpush.bf16.msra.mxu3 %v1046_v0  ;;  %v1195_v10 = vld [vmem:[%s1609_s3] ss:$0 sm:$0xff]  ;;  %v1049_v24 = vld [vmem:[%s1608_s2 + $0x10] sm:$0xff]  ;;  %v1048_v38 = vld [vmem:[%s1608_s2 + $0x8] sm:$0xff] }
   0xd   : > { %837 = vmatpush.bf16.msra.mxu1 %v1050_v20  ;;  %1053 = vmatpush.bf16.msra.mxu2 %v1050_v20  ;;  %v1047_v46 = vld [vmem:[%s1608_s2] sm:$0xff] }
   0xe   : > { %s1618_s19 = smov (!%p190_p3, %s959_s19), 63 }
   0xf   : > { %s960_s22 = sshll.u32 %s1618_s19, 2  ;;  %s962_s10 = sshll.u32 %s1618_s19, 3 }
  0x10   : > { %308 = vmatpush.bf16.msra.mxu0 %v1045_v1  ;;  %s193_s25 = scalar_lea.vmem %s1606_s0, %s960_s22  ;;  %1052 = vmatpush.bf16.msra.mxu3 %v1045_v1  ;;  %s1569_s16 = scalar_lea.vmem %s1610_s4, %s962_s10 }
  0x11   : > { %v1037_v2 = vld [vmem:[%s193_s25] sm:$0xff]  ;;  %v1042_v3 = vld [vmem:[%s193_s25 + $0x28] sm:$0xff]  ;;  %v1043_v5 = vld [vmem:[%s193_s25 + $0x30] sm:$0xff]  ;;  %838 = vmatpush.bf16.msra.mxu1 %v1049_v24  ;;  %1054 = vmatpush.bf16.msra.mxu2 %v1049_v24 }
  0x12   : > { %v1038_v4 = vld [vmem:[%s193_s25 + $0x8] sm:$0xff]  ;;  %v1039_v6 = vld [vmem:[%s193_s25 + $0x10] sm:$0xff]  ;;  %v1044_v7 = vld [vmem:[%s193_s25 + $0x38] sm:$0xff] }
  0x13   : > { %1003 = vmatmul.msk.bf16.vlgmr.msra.gmra.mxu0 %vm276_vm0, %v1037_v2  ;;  %1008 = vmatmul.msk.bf16.vlgmr.msra.gmra.mxu3 %vm276_vm0, %v1042_v3  ;;  %v1040_v8 = vld [vmem:[%s193_s25 + $0x18] sm:$0xff]  ;;  %v1041_v9 = vld [vmem:[%s193_s25 + $0x20] sm:$0xff] }
  0x15   : > { %839 = vmatpush.bf16.msra.mxu1 %v1048_v38  ;;  %1055 = vmatpush.bf16.msra.mxu2 %v1048_v38 }
  0x19   : > { %840 = vmatpush.bf16.msra.mxu1 %v1047_v46  ;;  %1056 = vmatpush.bf16.msra.mxu2 %v1047_v46 }
  0x23   : > { %1004 = vmatmul.msk.bf16.gmra.mxu0 %vm276_vm0, %v1038_v4  ;;  %1009 = vmatmul.msk.bf16.gmra.mxu3 %vm276_vm0, %v1043_v5 }
  0x33   : > { %1005 = vmatmul.msk.bf16.gmra.mxu0 %vm276_vm0, %v1039_v6  ;;  %1010 = vmatmul.msk.bf16.gmra.mxu3 %vm276_vm0, %v1044_v7 }
  0x43   : > { %1006 = vmatmul.msk.bf16.gmra.mxu0 %vm276_vm0, %v1040_v8 }
  0x53   : > { %1007 = vmatmul.msk.bf16.gmra.mxu0 %vm276_vm0, %v1041_v9 }
  0x90   : > { %v310_v11 = vpop.f32.mrf.mxu0 }
  0x91   : > { %v1198_v12 = vadd.f32 %v1195_v10, %v310_v11 }
  0x93   : > { %v1201_v13 = vmul.f32 0.70710677, %v1198_v12 }
  0x95   : > { %v382_v14 = vand.u32 2147483647, %v1201_v13  ;;  %vm686_vm2 = vcmp.lt.f32.partialorder %v1201_v13, 0.0  ;;  %v350_v13 = vmul.f32 0.5, %v1198_v12 }
  0x96   : > { %v335_v60 = vpop.f32.mrf.mxu3 }
  0x97   : > { %v398_v15 = vmul.f32 0.3275911, %v382_v14  ;;  %v590_v51 = vsub.f32 0.0, %v382_v14  ;;  %v1255_v63 = vadd.f32 %v1195_v10, %v335_v60 }
  0x98   : > { %v312_v16 = vpop.f32.mrf.mxu0 }
  0x99   : > { %v414_v17 = vadd.f32 1.0, %v398_v15  ;;  %v1205_v18 = vadd.f32 %v1195_v10, %v312_v16  ;;  %v606_v59 = vmul.f32 %v590_v51, %v382_v14  ;;  %v1266_v7 = vmul.f32 0.70710677, %v1255_v63 }
  0x9b   : > { %1067 = vrcp.f32 %v414_v17  ;;  %v1208_v19 = vmul.f32 0.70710677, %v1205_v18  ;;  %v622_v5 = vmul.f32 1.442695, %v606_v59  ;;  %v1275_v17 = vand.u32 2147483647, %v1266_v7 }
  0x9c   : > { %vm696_vm12 = vcmp.lt.f32.partialorder %v1266_v7, 0.0 }
  0x9d   : > { %v383_v21 = vand.u32 2147483647, %v1208_v19  ;;  %vm687_vm1 = vcmp.lt.f32.partialorder %v1208_v19, 0.0 }
  0x9f   : > { %v399_v22 = vmul.f32 0.3275911, %v383_v21  ;;  %v591_v44 = vsub.f32 0.0, %v383_v21 }
  0xa0   : > { %v315_v23 = vpop.f32.mrf.mxu0 }
  0xa1   : > { %v1217_v25 = vpop.eup %1067  ;;  %v415_v26 = vadd.f32 1.0, %v399_v22  ;;  %v1220_v27 = vadd.f32 %v1195_v10, %v315_v23  ;;  %v607_v55 = vmul.f32 %v591_v44, %v383_v21 }
  0xa2   : > { %v446_v28 = vmul.f32 1.0614054, %v1217_v25 }
  0xa3   : > { %1069 = vrcp.f32 %v415_v26  ;;  %v1224_v29 = vmul.f32 0.70710677, %v1220_v27  ;;  %v624_v62 = vmul.f32 1.442695, %v607_v55 }
  0xa4   : > { %v462_v30 = vadd.f32 -1.4531521, %v446_v28 }
  0xa5   : > { %v1227_v31 = vand.u32 2147483647, %v1224_v29  ;;  %vm688_vm4 = vcmp.lt.f32.partialorder %v1224_v29, 0.0 }
  0xa6   : > { %v478_v32 = vmul.f32 %v1217_v25, %v462_v30 }
  0xa7   : > { %v400_v37 = vmul.f32 0.3275911, %v1227_v31 }
  0xa8   : > { %v317_v33 = vpop.f32.mrf.mxu0  ;;  %v494_v40 = vadd.f32 1.4214138, %v478_v32 }
  0xa9   : > { %v1070_v34 = vpop.eup %1069  ;;  %v1231_v35 = vadd.f32 %v1195_v10, %v317_v33  ;;  %v416_v45 = vadd.f32 1.0, %v400_v37  ;;  %v408_v33 = vmul.f32 0.3275911, %v1275_v17 }
  0xaa   : > { %v447_v36 = vmul.f32 1.0614054, %v1070_v34  ;;  %v510_v48 = vmul.f32 %v1217_v25, %v494_v40 }
  0xab   : > { %v1238_v39 = vmul.f32 0.70710677, %v1231_v35  ;;  %1071 = vrcp.f32 %v416_v45  ;;  %v424_v44 = vadd.f32 1.0, %v408_v33 }
  0xac   : > { %v463_v41 = vadd.f32 -1.4531521, %v447_v36  ;;  %v526_v56 = vadd.f32 -0.28449672, %v510_v48 }
  0xad   : > { %v1241_v42 = vand.u32 2147483647, %v1238_v39  ;;  %vm689_vm5 = vcmp.lt.f32.partialorder %v1238_v39, 0.0 }
  0xae   : > { %v479_v43 = vmul.f32 %v1070_v34, %v463_v41  ;;  %v542_v1 = vmul.f32 %v1217_v25, %v526_v56  ;;  %v337_v41 = vpop.f32.mrf.mxu3 }
  0xaf   : > { %v401_v47 = vmul.f32 0.3275911, %v1241_v42  ;;  %v1289_v46 = vadd.f32 %v1195_v10, %v337_v41  ;;  %v593_v55 = vsub.f32 0.0, %v1241_v42 }
  0xb0   : > { %v495_v49 = vadd.f32 1.4214138, %v479_v43  ;;  %v320_v50 = vpop.f32.mrf.mxu0  ;;  %v558_v11 = vadd.f32 0.2548296, %v542_v1 }
  0xb1   : > { %v417_v52 = vadd.f32 1.0, %v401_v47  ;;  %v1249_v53 = vadd.f32 %v1195_v10, %v320_v50  ;;  %v1257_v0 = vpop.eup %1071  ;;  %v1299_v56 = vmul.f32 0.70710677, %v1289_v46 }
  0xb2   : > { %v511_v54 = vmul.f32 %v1070_v34, %v495_v49  ;;  %v448_v14 = vmul.f32 1.0614054, %v1257_v0  ;;  %v574_v23 = vmul.f32 %v1217_v25, %v558_v11  ;;  %v609_v11 = vmul.f32 %v593_v55, %v1241_v42 }
  0xb3   : > { %1073 = vrcp.f32 %v417_v52  ;;  %v1252_v58 = vmul.f32 0.70710677, %v1249_v53  ;;  %vm697_vm13 = vcmp.lt.f32.partialorder %v1299_v56, 0.0 }
  0xb4   : > { %v527_v57 = vadd.f32 -0.28449672, %v511_v54  ;;  %1075 = vpow2.f32 %v624_v62  ;;  %v464_v24 = vadd.f32 -1.4531521, %v448_v14  ;;  %v1320_v14 = vand.u32 2147483647, %v1299_v56 }
  0xb5   : > { %v1261_v2 = vand.u32 2147483647, %v1252_v58  ;;  %1077 = vpow2.f32 %v622_v5  ;;  %v592_v5 = vsub.f32 0.0, %v1227_v31  ;;  %v628_v41 = vmul.f32 1.442695, %v609_v11 }
  0xb6   : > { %v543_v61 = vmul.f32 %v1070_v34, %v527_v57  ;;  %v480_v40 = vmul.f32 %v1257_v0, %v464_v24  ;;  %vm690_vm6 = vcmp.lt.f32.partialorder %v1252_v58, 0.0 }
  0xb7   : > { %v402_v15 = vmul.f32 0.3275911, %v1261_v2  ;;  %v608_v42 = vmul.f32 %v592_v5, %v1227_v31 }
  0xb8   : > { %v322_v3 = vpop.f32.mrf.mxu0  ;;  %v559_v6 = vadd.f32 0.2548296, %v543_v61  ;;  %v496_v48 = vadd.f32 1.4214138, %v480_v40 }
  0xb9   : > { %v1263_v4 = vpop.eup %1073  ;;  %v1270_v9 = vadd.f32 %v1195_v10, %v322_v3  ;;  %v418_v26 = vadd.f32 1.0, %v402_v15  ;;  %v626_v31 = vmul.f32 1.442695, %v608_v42 }
  0xba   : > { %v449_v8 = vmul.f32 1.0614054, %v1263_v4  ;;  %v575_v16 = vmul.f32 %v1070_v34, %v559_v6  ;;  %v1076_v22 = vpop.eup %1075  ;;  %v512_v59 = vmul.f32 %v1257_v0, %v496_v48 }
  0xbb   : > { %v1278_v21 = vmul.f32 0.70710677, %v1270_v9  ;;  %v1078_v34 = vpop.eup %1077  ;;  %1079 = vrcp.f32 %v418_v26 }
  0xbc   : > { %v465_v20 = vadd.f32 -1.4531521, %v449_v8  ;;  %v655_v30 = vmul.f32 %v1076_v22, %v575_v16  ;;  %v654_v38 = vmul.f32 %v1078_v34, %v574_v23  ;;  %v528_v22 = vadd.f32 -0.28449672, %v512_v59 }
  0xbd   : > { %v1282_v32 = vand.u32 2147483647, %v1278_v21  ;;  %vm691_vm7 = vcmp.lt.f32.partialorder %v1278_v21, 0.0 }
  0xbe   : > { %v481_v36 = vmul.f32 %v1263_v4, %v465_v20  ;;  %v671_v25 = vsub.f32 1.0, %v655_v30  ;;  %v670_v47 = vsub.f32 1.0, %v654_v38  ;;  %v351_v30 = vmul.f32 0.5, %v1205_v18  ;;  %v340_v38 = vpop.f32.mrf.mxu3 }
  0xbf   : > { %v403_v37 = vmul.f32 0.3275911, %v1282_v32  ;;  %v544_v40 = vmul.f32 %v1257_v0, %v528_v22 }
  0xc0   : > { %v325_v28 = vpop.f32.mrf.mxu0  ;;  %v497_v45 = vadd.f32 1.4214138, %v481_v36  ;;  %v703_v49 = vsub.f32 0.0, %v671_v25  ;;  %v702_v57 = vsub.f32 0.0, %v670_v47 }
  0xc1   : > { %v419_v43 = vadd.f32 1.0, %v403_v37  ;;  %v1291_v50 = vpop.eup %1079  ;;  %v1294_v51 = vadd.f32 %v1195_v10, %v325_v28  ;;  %v560_v55 = vadd.f32 0.2548296, %v544_v40  ;;  %v600_v40 = vsub.f32 0.0, %v1275_v17 }
  0xc2   : > { %v513_v54 = vmul.f32 %v1263_v4, %v497_v45  ;;  %v719_v62 = vsel %vm687_vm1, %v703_v49, %v671_v25  ;;  %v450_v1 = vmul.f32 1.0614054, %v1291_v50  ;;  %v718_v16 = vsel %vm686_vm2, %v702_v57, %v670_v47 }
  0xc3   : > { %1081 = vrcp.f32 %v419_v43  ;;  %v1304_v60 = vmul.f32 0.70710677, %v1294_v51  ;;  %v735_v20 = vadd.f32 1.0, %v719_v62  ;;  %v734_v33 = vadd.f32 1.0, %v718_v16 }
  0xc4   : > { %1083 = vrcp.f32 %v424_v44  ;;  %v529_v19 = vadd.f32 -0.28449672, %v513_v54  ;;  %v466_v24 = vadd.f32 -1.4531521, %v450_v1  ;;  %v409_v43 = vmul.f32 0.3275911, %v1320_v14 }
  0xc5   : > { %v1315_v8 = vand.u32 2147483647, %v1304_v60  ;;  %v751_v44 = vmul.f32 %v735_v20, %v351_v30  ;;  %v750_v45 = vmul.f32 %v734_v33, %v350_v13  ;;  %v576_v20 = vmul.f32 %v1257_v0, %v560_v55 }
  0xc6   : > { %v545_v34 = vmul.f32 %v1263_v4, %v529_v19  ;;  %v482_v12 = vmul.f32 %v1291_v50, %v466_v24  ;;  %v425_v54 = vadd.f32 1.0, %v409_v43  ;;  %v342_v24 = vpop.f32.mrf.mxu3  ;;  %v1358_v30 = vadd.f32 %v1195_v10, %v340_v38 }
  0xc7   : > { %v404_v26 = vmul.f32 0.3275911, %v1315_v8  ;;  %v766_v62 = vpack.c.bf16 %v751_v44, %v750_v45  ;;  %v594_v33 = vsub.f32 0.0, %v1261_v2  ;;  %vm692_vm9 = vcmp.lt.f32.partialorder %v1304_v60, 0.0 }
  0xc8   : > { %v327_v52 = vpop.f32.mrf.mxu0  ;;  %v561_v47 = vadd.f32 0.2548296, %v545_v34  ;;  %v498_v57 = vadd.f32 1.4214138, %v482_v12 }
  0xc9   : > { %v1306_v61 = vpop.eup %1081  ;;  %v1310_v3 = vadd.f32 %v1195_v10, %v327_v52  ;;  %v420_v37 = vadd.f32 1.0, %v404_v26  ;;  %1027 = vmatmul.msk.bf16.vlgmr.msra.gmra.mxu1 %vm808_vm3, %v766_v62 }
  0xca   : > { %v451_v6 = vmul.f32 1.0614054, %v1306_v61  ;;  %v1322_v15 = vpop.eup %1083  ;;  %v514_v22 = vmul.f32 %v1291_v50, %v498_v57 }
  0xcb   : > { %v1326_v28 = vmul.f32 0.70710677, %v1310_v3  ;;  %v456_v36 = vmul.f32 1.0614054, %v1322_v15  ;;  %1085 = vrcp.f32 %v420_v37  ;;  %v1365_v37 = vmul.f32 0.5, %v1231_v35 }
  0xcc   : > { %v467_v23 = vadd.f32 -1.4531521, %v451_v6  ;;  %1087 = vpow2.f32 %v628_v41  ;;  %v577_v6 = vmul.f32 %v1263_v4, %v561_v47  ;;  %v1354_v4 = vmul.f32 0.5, %v1220_v27 }
  0xcd   : > { %v1338_v18 = vand.u32 2147483647, %v1326_v28  ;;  %v472_v48 = vadd.f32 -1.4531521, %v456_v36  ;;  %1089 = vpow2.f32 %v626_v31  ;;  %v1369_v41 = vadd.f32 %v1195_v10, %v342_v24 }
  0xce   : > { %v483_v25 = vmul.f32 %v1306_v61, %v467_v23  ;;  %v595_v23 = vsub.f32 0.0, %v1282_v32  ;;  %v530_v43 = vadd.f32 -0.28449672, %v514_v22  ;;  %v1380_v35 = vmul.f32 0.70710677, %v1358_v30 }
  0xcf   : > { %v405_v49 = vmul.f32 0.3275911, %v1338_v18  ;;  %v488_v19 = vmul.f32 %v1322_v15, %v472_v48  ;;  %v1390_v57 = vmul.f32 0.70710677, %v1369_v41  ;;  %vm693_vm8 = vcmp.lt.f32.partialorder %v1326_v28, 0.0 }
  0xd0   : > { %v499_v52 = vadd.f32 1.4214138, %v483_v25  ;;  %v330_v1 = vpop.f32.mrf.mxu0  ;;  %v611_v44 = vmul.f32 %v595_v23, %v1282_v32  ;;  %vm698_vm14 = vcmp.lt.f32.partialorder %v1380_v35, 0.0 }
  0xd1   : > { %v421_v59 = vadd.f32 1.0, %v405_v49  ;;  %v1341_v5 = vpop.eup %1085  ;;  %v1348_v16 = vadd.f32 %v1195_v10, %v330_v1  ;;  %v504_v34 = vadd.f32 1.4214138, %v488_v19  ;;  %v610_v49 = vmul.f32 %v594_v33, %v1261_v2 }
  0xd2   : > { %v515_v11 = vmul.f32 %v1306_v61, %v499_v52  ;;  %v1088_v26 = vpop.eup %1087  ;;  %v452_v13 = vmul.f32 1.0614054, %v1341_v5  ;;  %v632_v62 = vmul.f32 1.442695, %v611_v44  ;;  %v546_v2 = vmul.f32 %v1291_v50, %v530_v43 }
  0xd3   : > { %1091 = vrcp.f32 %v421_v59  ;;  %v657_v42 = vmul.f32 %v1088_v26, %v577_v6  ;;  %v1362_v0 = vmul.f32 0.70710677, %v1348_v16  ;;  %v1090_v36 = vpop.eup %1089  ;;  %v520_v52 = vmul.f32 %v1322_v15, %v504_v34 }
  0xd4   : > { %1093 = vrcp.f32 %v425_v54  ;;  %v531_v27 = vadd.f32 -0.28449672, %v515_v11  ;;  %v656_v38 = vmul.f32 %v1090_v36, %v576_v20  ;;  %v468_v45 = vadd.f32 -1.4531521, %v452_v13  ;;  %v345_v36 = vpop.f32.mrf.mxu3 }
  0xd5   : > { %v1375_v12 = vand.u32 2147483647, %v1362_v0  ;;  %v673_v48 = vsub.f32 1.0, %v657_v42  ;;  %v1396_v11 = vand.u32 2147483647, %v1380_v35  ;;  %v616_v13 = vmul.f32 %v600_v40, %v1275_v17 }
  0xd6   : > { %v547_v32 = vmul.f32 %v1306_v61, %v531_v27  ;;  %v672_v59 = vsub.f32 1.0, %v656_v38  ;;  %v484_v19 = vmul.f32 %v1341_v5, %v468_v45  ;;  %v630_v24 = vmul.f32 1.442695, %v610_v49 }
  0xd7   : > { %v406_v54 = vmul.f32 0.3275911, %v1375_v12  ;;  %v705_v23 = vsub.f32 0.0, %v673_v48  ;;  %v536_v26 = vadd.f32 -0.28449672, %v520_v52  ;;  %v1408_v49 = vmul.f32 0.5, %v1249_v53 }
  0xd8   : > { %v332_v22 = vpop.f32.mrf.mxu0  ;;  %v563_v42 = vadd.f32 0.2548296, %v547_v32  ;;  %v1401_v34 = vand.u32 2147483647, %v1390_v57  ;;  %v704_v27 = vsub.f32 0.0, %v672_v59  ;;  %v597_v40 = vsub.f32 0.0, %v1338_v18 }
  0xd9   : > { %v1371_v25 = vpop.eup %1091  ;;  %v422_v6 = vadd.f32 1.0, %v406_v54  ;;  %v1404_v43 = vadd.f32 %v1195_v10, %v332_v22  ;;  %v562_v44 = vadd.f32 0.2548296, %v546_v2  ;;  %v500_v45 = vadd.f32 1.4214138, %v484_v19 }
  0xda   : > { %v1377_v31 = vpop.eup %1093  ;;  %v453_v47 = vmul.f32 1.0614054, %v1371_v25  ;;  %v1410_v17 = vmul.f32 1.442695, %v616_v13  ;;  %v721_v52 = vsel %vm689_vm5, %v705_v23, %v673_v48  ;;  %v579_v54 = vmul.f32 %v1306_v61, %v563_v42 }
  0xdb   : > { %v457_v1 = vmul.f32 1.0614054, %v1377_v31  ;;  %1095 = vrcp.f32 %v422_v6  ;;  %v1421_v53 = vmul.f32 %v1322_v15, %v536_v26  ;;  %v1425_v6 = vmul.f32 0.70710677, %v1404_v43 }
  0xdc   : > { %v469_v55 = vadd.f32 -1.4531521, %v453_v47  ;;  %1097 = vpow2.f32 %v632_v62  ;;  %v410_v47 = vmul.f32 0.3275911, %v1396_v11  ;;  %v720_v62 = vsel %vm688_vm4, %v704_v27, %v672_v59 }
  0xdd   : > { %v473_v38 = vadd.f32 -1.4531521, %v457_v1  ;;  %1099 = vpow2.f32 %v630_v24  ;;  %v578_v39 = vmul.f32 %v1291_v50, %v562_v44  ;;  %v516_v61 = vmul.f32 %v1341_v5, %v500_v45 }
  0xde   : > { %v485_v20 = vmul.f32 %v1371_v25, %v469_v55  ;;  %v411_v55 = vmul.f32 0.3275911, %v1401_v34  ;;  %v596_v48 = vsub.f32 0.0, %v1315_v8  ;;  %v426_v19 = vadd.f32 1.0, %v410_v47 }
  0xdf   : > { %v489_v1 = vmul.f32 %v1377_v31, %v473_v38  ;;  %v737_v29 = vadd.f32 1.0, %v721_v52  ;;  %v613_v59 = vmul.f32 %v597_v40, %v1338_v18  ;;  %v1435_v23 = vand.u32 2147483647, %v1425_v6  ;;  %v347_v40 = vpop.f32.mrf.mxu3 }
  0xe0   : > { %v501_v33 = vadd.f32 1.4214138, %v485_v20  ;;  %v427_v13 = vadd.f32 1.0, %v411_v55  ;;  %v1438_v42 = vadd.f32 %v1195_v10, %v345_v36  ;;  %v598_v38 = vsub.f32 0.0, %v1375_v12 }
  0xe1   : > { %v1427_v2 = vpop.eup %1095  ;;  %v407_v44 = vmul.f32 0.3275911, %v1435_v23  ;;  %v532_v18 = vadd.f32 -0.28449672, %v516_v61  ;;  %v612_v47 = vmul.f32 %v596_v48, %v1315_v8  ;;  %1101 = vrcp.f32 %v426_v19 }
  0xe2   : > { %v517_v32 = vmul.f32 %v1371_v25, %v501_v33  ;;  %v1098_v20 = vpop.eup %1097  ;;  %v454_v22 = vmul.f32 1.0614054, %v1427_v2  ;;  %1613 = vst [vmem:[#allocation2_spill] sm:$0xff] %v1438_v42  ;;  %v736_v33 = vadd.f32 1.0, %v720_v62  ;;  %v753_v52 = vmul.f32 %v737_v29, %v1365_v37 }
  0xe3   : > { %v659_v24 = vmul.f32 %v1098_v20, %v579_v54  ;;  %v1100_v50 = vpop.eup %1099  ;;  %v636_v54 = vmul.f32 1.442695, %v613_v59  ;;  %v423_v36 = vadd.f32 1.0, %v407_v44  ;;  %1103 = vrcp.f32 %v427_v13 }
  0xe4   : > { %v533_v26 = vadd.f32 -0.28449672, %v517_v32  ;;  %v470_v27 = vadd.f32 -1.4531521, %v454_v22  ;;  %v658_v45 = vmul.f32 %v1100_v50, %v578_v39  ;;  %v1447_v20 = vmul.f32 0.70710677, %v1438_v42 }
  0xe5   : > { %v675_v55 = vsub.f32 1.0, %v659_v24  ;;  %v614_v8 = vmul.f32 %v598_v38, %v1375_v12  ;;  %1105 = vrcp.f32 %v423_v36  ;;  %v1452_v61 = vadd.f32 %v1195_v10, %v347_v40 }
  0xe6   : > { %v486_v32 = vmul.f32 %v1427_v2, %v470_v27  ;;  %v549_v62 = vmul.f32 %v1371_v25, %v533_v26  ;;  %v674_v37 = vsub.f32 1.0, %v658_v45  ;;  %v505_v48 = vadd.f32 1.4214138, %v489_v1 }
  0xe7   : > { %1614 = vst [vmem:[#allocation3_spill] sm:$0xff] %v1452_v61  ;;  %v548_v19 = vmul.f32 %v1341_v5, %v532_v18  ;;  %v634_v29 = vmul.f32 1.442695, %v612_v47  ;;  %v752_v59 = vmul.f32 %v736_v33, %v1354_v4  ;;  %v601_v22 = vsub.f32 0.0, %v1320_v14  ;;  %v1459_v26 = vpop.eup %1101 }
  0xe8   : > { %v502_v39 = vadd.f32 1.4214138, %v486_v32  ;;  %v707_v12 = vsub.f32 0.0, %v675_v55  ;;  %v565_v13 = vadd.f32 0.2548296, %v549_v62  ;;  %1107 = vpow2.f32 %v636_v54 }
  0xe9   : > { %v1462_v10 = vand.u32 2147483647, %v1447_v20  ;;  %v638_v50 = vmul.f32 1.442695, %v614_v8  ;;  %v1465_v27 = vmul.f32 0.70710677, %v1452_v61  ;;  %v767_v4 = vpack.c.bf16 %v753_v52, %v752_v59  ;;  %v1467_v33 = vpop.eup %1103 }
  0xea   : > { %v518_v24 = vmul.f32 %v1427_v2, %v502_v39  ;;  %v706_v38 = vsub.f32 0.0, %v674_v37  ;;  %v521_v44 = vmul.f32 %v1377_v31, %v505_v48  ;;  %v564_v45 = vadd.f32 0.2548296, %v548_v19 }
  0xeb   : > { %1109 = vpow2.f32 %v634_v29  ;;  %v1470_v18 = vpop.eup %1105  ;;  %v458_v47 = vmul.f32 1.0614054, %v1459_v26  ;;  %v599_v54 = vsub.f32 0.0, %v1435_v23  ;;  %v1476_v32 = vand.u32 2147483647, %v1465_v27  ;;  %1028 = vmatmul.msk.bf16.gmra.mxu1 %vm808_vm3, %v767_v4 }
  0xec   : > { %v534_v1 = vadd.f32 -0.28449672, %v518_v24  ;;  %v723_v52 = vsel %vm691_vm7, %v707_v12, %v675_v55  ;;  %v581_v36 = vmul.f32 %v1371_v25, %v565_v13  ;;  %v412_v62 = vmul.f32 0.3275911, %v1462_v10 }
  0xed   : > { %v455_v39 = vmul.f32 1.0614054, %v1470_v18  ;;  %v459_v8 = vmul.f32 1.0614054, %v1467_v33  ;;  %1111 = vpow2.f32 %v638_v50  ;;  %v413_v19 = vmul.f32 0.3275911, %v1476_v32 }
  0xee   : > { %v550_v40 = vmul.f32 %v1427_v2, %v534_v1  ;;  %v1108_v29 = vpop.eup %1107  ;;  %v722_v59 = vsel %vm690_vm6, %v706_v38, %v674_v37  ;;  %v617_v24 = vmul.f32 %v601_v22, %v1320_v14  ;;  %v580_v21 = vmul.f32 %v1341_v5, %v564_v45 }
  0xef   : > { %v471_v55 = vadd.f32 -1.4531521, %v455_v39  ;;  %v355_v25 = vmul.f32 0.5, %v1270_v9  ;;  %v739_v12 = vadd.f32 1.0, %v723_v52  ;;  %v537_v13 = vadd.f32 -0.28449672, %v521_v44 }
  0xf0   : > { %v566_v48 = vadd.f32 0.2548296, %v550_v40  ;;  %v615_v1 = vmul.f32 %v599_v54, %v1435_v23  ;;  %v661_v40 = vmul.f32 %v1108_v29, %v581_v36  ;;  %v428_v61 = vadd.f32 1.0, %v412_v62 }
  0xf1   : > { %v1110_v4 = vpop.eup %1109  ;;  %v487_v42 = vmul.f32 %v1470_v18, %v471_v55  ;;  %v738_v58 = vadd.f32 1.0, %v722_v59  ;;  %v474_v37 = vadd.f32 -1.4531521, %v458_v47  ;;  %v475_v38 = vadd.f32 -1.4531521, %v459_v8 }
  0xf2   : > { %v582_v50 = vmul.f32 %v1427_v2, %v566_v48  ;;  %v429_v14 = vadd.f32 1.0, %v413_v19  ;;  %1113 = vpow2.f32 %v1410_v17  ;;  %v644_v5 = vmul.f32 1.442695, %v617_v24 }
  0xf3   : > { %v660_v22 = vmul.f32 %v1110_v4, %v580_v21  ;;  %v503_v9 = vadd.f32 1.4214138, %v487_v42  ;;  %v1112_v45 = vpop.eup %1111  ;;  %v568_v44 = vadd.f32 0.2548296, %v1421_v53  ;;  %v755_v23 = vmul.f32 %v739_v12, %v355_v25 }
  0xf4   : > { %v553_v54 = vmul.f32 %v1377_v31, %v537_v13  ;;  %v640_v52 = vmul.f32 1.442695, %v615_v1  ;;  %v677_v2 = vsub.f32 1.0, %v661_v40  ;;  %v662_v36 = vmul.f32 %v1112_v45, %v582_v50 }
  0xf5   : > { %1115 = vrcp.f32 %v428_v61  ;;  %v519_v62 = vmul.f32 %v1470_v18, %v503_v9  ;;  %v754_v47 = vmul.f32 %v738_v58, %v1408_v49  ;;  %v490_v39 = vmul.f32 %v1459_v26, %v474_v37 }
  0xf6   : > { %v491_v17 = vmul.f32 %v1467_v33, %v475_v38  ;;  %1117 = vrcp.f32 %v429_v14  ;;  %v676_v42 = vsub.f32 1.0, %v660_v22  ;;  %v584_v53 = vmul.f32 %v1322_v15, %v568_v44 }
  0xf7   : > { %1119 = vpow2.f32 %v644_v5  ;;  %v535_v8 = vadd.f32 -0.28449672, %v519_v62  ;;  %v569_v48 = vadd.f32 0.2548296, %v553_v54  ;;  %v768_v19 = vpack.c.bf16 %v755_v23, %v754_v47 }
  0xf8   : > { %1121 = vpow2.f32 %v640_v52  ;;  %v1114_v29 = vpop.eup %1113  ;;  %v709_v59 = vsub.f32 0.0, %v677_v2  ;;  %v678_v61 = vsub.f32 1.0, %v662_v36  ;;  %v506_v21 = vadd.f32 1.4214138, %v490_v39 }
  0xf9   : > { %v551_v24 = vmul.f32 %v1470_v18, %v535_v8  ;;  %v507_v49 = vadd.f32 1.4214138, %v491_v17  ;;  %v708_v25 = vsub.f32 0.0, %v676_v42  ;;  %v1507_v1 = vmul.f32 %v1114_v29, %v584_v53 }
  0xfa   : > { %v585_v15 = vmul.f32 %v1377_v31, %v569_v48  ;;  %v602_v4 = vsub.f32 0.0, %v1396_v11  ;;  %v725_v50 = vsel %vm693_vm8, %v709_v59, %v677_v2  ;;  %v603_v58 = vsub.f32 0.0, %v1401_v34 }
  0xfb   : > { %v1503_v55 = vpop.eup %1115  ;;  %v567_v12 = vadd.f32 0.2548296, %v551_v24  ;;  %1029 = vmatmul.msk.bf16.gmra.mxu1 %vm808_vm3, %v768_v19  ;;  %v710_v37 = vsub.f32 0.0, %v678_v61  ;;  %v522_v5 = vmul.f32 %v1459_v26, %v506_v21  ;;  %v523_v31 = vmul.f32 %v1467_v33, %v507_v49 }
  0xfc   : > { %v1505_v13 = vpop.eup %1117  ;;  %v724_v22 = vsel %vm692_vm9, %v708_v25, %v676_v42  ;;  %v460_v9 = vmul.f32 1.0614054, %v1503_v55  ;;  %v680_v44 = vsub.f32 1.0, %v1507_v1  ;;  %v618_v23 = vmul.f32 %v602_v4, %v1396_v11 }
  0xfd   : > { %v1120_v40 = vpop.eup %1119  ;;  %v583_v38 = vmul.f32 %v1470_v18, %v567_v12  ;;  %v461_v45 = vmul.f32 1.0614054, %v1505_v13  ;;  %v741_v54 = vadd.f32 1.0, %v725_v50  ;;  %vm694_vm10 = vcmp.lt.f32.partialorder %v1362_v0, 0.0 }
  0xfe   : > { %v1122_v14 = vpop.eup %1121  ;;  %v665_v18 = vmul.f32 %v1120_v40, %v585_v15  ;;  %v619_v60 = vmul.f32 %v603_v58, %v1401_v34  ;;  %v726_v52 = vsel %vm694_vm10, %v710_v37, %v678_v61  ;;  %v740_v36 = vadd.f32 1.0, %v724_v22 }
  0xff   : > { %v663_v28 = vmul.f32 %v1122_v14, %v583_v38  ;;  %v538_v62 = vadd.f32 -0.28449672, %v522_v5  ;;  %v357_v47 = vmul.f32 0.5, %v1310_v3  ;;  %v539_v39 = vadd.f32 -0.28449672, %v523_v31 }
 0x100   : > { %v356_v17 = vmul.f32 0.5, %v1294_v51  ;;  %v476_v42 = vadd.f32 -1.4531521, %v460_v9  ;;  %v477_v53 = vadd.f32 -1.4531521, %v461_v45  ;;  %v742_v19 = vadd.f32 1.0, %v726_v52 }
 0x101   : > { %v679_v2 = vsub.f32 1.0, %v663_v28  ;;  %v646_v48 = vmul.f32 1.442695, %v618_v23  ;;  %v757_v11 = vmul.f32 %v741_v54, %v357_v47  ;;  %vm695_vm11 = vcmp.lt.f32.partialorder %v1425_v6, 0.0 }
 0x102   : > { %v681_v0 = vsub.f32 1.0, %v665_v18  ;;  %v648_v29 = vmul.f32 1.442695, %v619_v60  ;;  %v358_v34 = vmul.f32 0.5, %v1348_v16  ;;  %v756_v61 = vmul.f32 %v740_v36, %v356_v17 }
 0x103   : > { %v711_v8 = vsub.f32 0.0, %v679_v2  ;;  %v554_v24 = vmul.f32 %v1459_v26, %v538_v62  ;;  %v359_v3 = vmul.f32 0.5, %v1404_v43  ;;  %v555_v51 = vmul.f32 %v1467_v33, %v539_v39 }
 0x104   : > { %v492_v49 = vmul.f32 %v1503_v55, %v476_v42  ;;  %v493_v25 = vmul.f32 %v1505_v13, %v477_v53  ;;  %v758_v12 = vmul.f32 %v742_v19, %v358_v34  ;;  %v769_v6 = vpack.c.bf16 %v757_v11, %v756_v61 }
 0x105   : > { %v727_v59 = vsel %vm695_vm11, %v711_v8, %v679_v2  ;;  %v712_v15 = vsub.f32 0.0, %v680_v44  ;;  %1123 = vpow2.f32 %v646_v48  ;;  %v713_v16 = vsub.f32 0.0, %v681_v0 }
 0x106   : > { %v743_v21 = vadd.f32 1.0, %v727_v59  ;;  %v570_v4 = vadd.f32 0.2548296, %v554_v24  ;;  %1125 = vpow2.f32 %v648_v29  ;;  %v571_v40 = vadd.f32 0.2548296, %v555_v51 }
 0x107   : > { %v508_v50 = vadd.f32 1.4214138, %v492_v49  ;;  %v509_v58 = vadd.f32 1.4214138, %v493_v25  ;;  %v604_v37 = vsub.f32 0.0, %v1462_v10  ;;  %v728_v38 = vsel %vm696_vm12, %v712_v15, %v680_v44 }
 0x108   : > { %v759_v1 = vmul.f32 %v743_v21, %v359_v3  ;;  %v729_v14 = vsel %vm697_vm13, %v713_v16, %v681_v0  ;;  %v605_v7 = vsub.f32 0.0, %v1476_v32  ;;  %v586_v56 = vmul.f32 %v1459_v26, %v570_v4  ;;  %v1616_v4 = vld [vmem:[#allocation3_spill] sm:$0xff] }
 0x109   : > { %v587_v31 = vmul.f32 %v1467_v33, %v571_v40  ;;  %v524_v22 = vmul.f32 %v1503_v55, %v508_v50  ;;  %v525_v9 = vmul.f32 %v1505_v13, %v509_v58  ;;  %v360_v45 = vmul.f32 0.5, %v1255_v63 }
 0x10a   : > { %v770_v43 = vpack.c.bf16 %v759_v1, %v758_v12  ;;  %v620_v23 = vmul.f32 %v604_v37, %v1462_v10  ;;  %v744_v54 = vadd.f32 1.0, %v728_v38  ;;  %v361_v44 = vmul.f32 0.5, %v1289_v46 }
 0x10b   : > { %1030 = vmatmul.msk.bf16.gmra.mxu1 %vm808_vm3, %v769_v6  ;;  %v1124_v5 = vpop.eup %1123  ;;  %v745_v18 = vadd.f32 1.0, %v729_v14  ;;  %v621_v60 = vmul.f32 %v605_v7, %v1476_v32  ;;  %v540_v26 = vadd.f32 -0.28449672, %v524_v22  ;;  %v541_v36 = vadd.f32 -0.28449672, %v525_v9 }
 0x10c   : > { %1031 = vmatmul.msk.bf16.vlgmr.msra.gmra.mxu2 %vm808_vm3, %v770_v43  ;;  %v1126_v28 = vpop.eup %1125  ;;  %v666_v52 = vmul.f32 %v1124_v5, %v586_v56  ;;  %v650_v33 = vmul.f32 1.442695, %v620_v23  ;;  %v760_v62 = vmul.f32 %v744_v54, %v360_v45  ;;  %vm699_vm15 = vcmp.lt.f32.partialorder %v1390_v57, 0.0 }
 0x10d   : > { %v667_v2 = vmul.f32 %v1126_v28, %v587_v31  ;;  %v761_v47 = vmul.f32 %v745_v18, %v361_v44  ;;  %v652_v39 = vmul.f32 1.442695, %v621_v60  ;;  %v556_v63 = vmul.f32 %v1503_v55, %v540_v26 }
 0x10e   : > { %v682_v17 = vsub.f32 1.0, %v666_v52  ;;  %v557_v10 = vmul.f32 %v1505_v13, %v541_v36  ;;  %1127 = vpow2.f32 %v650_v33  ;;  %v362_v61 = vmul.f32 0.5, %v1358_v30 }
 0x10f   : > { %v683_v42 = vsub.f32 1.0, %v667_v2  ;;  %1129 = vpow2.f32 %v652_v39  ;;  %v771_v46 = vpack.c.bf16 %v761_v47, %v760_v62  ;;  %v572_v32 = vadd.f32 0.2548296, %v556_v63 }
 0x110   : > { %v714_v8 = vsub.f32 0.0, %v682_v17  ;;  %v573_v48 = vadd.f32 0.2548296, %v557_v10  ;;  %v363_v3 = vmul.f32 0.5, %v1369_v41  ;;  %vm700_vm1 = vcmp.lt.f32.partialorder %v1447_v20, 0.0  ;;  %v1615_v41 = vld [vmem:[#allocation2_spill] sm:$0xff] }
 0x111   : > { %v715_v53 = vsub.f32 0.0, %v683_v42  ;;  %v588_v29 = vmul.f32 %v1503_v55, %v572_v32  ;;  %vm701_vm2 = vcmp.lt.f32.partialorder %v1465_v27, 0.0  ;;  %v365_v43 = vmul.f32 0.5, %v1616_v4  ;;  %v1066_v20 = vld [vmem:[%s1609_s3 + $0x1] ss:$0 sm:$0xff] }
 0x112   : > { %v730_v19 = vsel %vm698_vm14, %v714_v8, %v682_v17  ;;  %v589_v34 = vmul.f32 %v1505_v13, %v573_v48  ;;  %v364_v13 = vmul.f32 0.5, %v1615_v41 }
 0x113   : > { %v731_v0 = vsel %vm699_vm15, %v715_v53, %v683_v42  ;;  %v746_v24 = vadd.f32 1.0, %v730_v19 }
 0x114   : > { %v1128_v11 = vpop.eup %1127  ;;  %v747_v21 = vadd.f32 1.0, %v731_v0 }
 0x115   : > { %v1130_v59 = vpop.eup %1129  ;;  %v668_v51 = vmul.f32 %v1128_v11, %v588_v29  ;;  %v762_v49 = vmul.f32 %v746_v24, %v362_v61 }
 0x116   : > { %v669_v35 = vmul.f32 %v1130_v59, %v589_v34  ;;  %v763_v57 = vmul.f32 %v747_v21, %v363_v3 }
 0x117   : > { %v684_v25 = vsub.f32 1.0, %v668_v51 }
 0x118   : > { %v685_v12 = vsub.f32 1.0, %v669_v35  ;;  %v772_v1 = vpack.c.bf16 %v763_v57, %v762_v49 }
 0x119   : > { %v716_v6 = vsub.f32 0.0, %v684_v25 }
 0x11a   : > { %v717_v15 = vsub.f32 0.0, %v685_v12 }
 0x11b   : > { %v732_v30 = vsel %vm700_vm1, %v716_v6, %v684_v25 }
 0x11c   : > { %1032 = vmatmul.msk.bf16.gmra.mxu2 %vm808_vm3, %v771_v46  ;;  %v733_v55 = vsel %vm701_vm2, %v717_v15, %v685_v12  ;;  %v748_v16 = vadd.f32 1.0, %v732_v30 }
 0x11d   : > { %v749_v40 = vadd.f32 1.0, %v733_v55 }
 0x11e   : > { %v764_v50 = vmul.f32 %v748_v16, %v364_v13 }
 0x11f   : > { %v765_v58 = vmul.f32 %v749_v40, %v365_v43 }
 0x121   : > { %v773_v37 = vpack.c.bf16 %v765_v58, %v764_v50 }
 0x12c   : > { %1033 = vmatmul.msk.bf16.gmra.mxu2 %vm808_vm3, %v772_v1 }
 0x13c   : > { %1034 = vmatmul.msk.bf16.gmra.mxu2 %vm808_vm3, %v773_v37 }
 0x146   : > { %v842_v27 = vpop.f32.mrf.mxu1 }
 0x147   : > { %v843_v38 = vadd.f32 %v1066_v20, %v842_v27 }
 0x149   : > { %882 = vst.msk [vmem:[%s1569_s16] sm:$0xff] %vm276_vm0, %v843_v38 }
 0x14e   : > { %v844_v14 = vpop.f32.mrf.mxu1 }
 0x14f   : > { %v845_v7 = vadd.f32 %v1066_v20, %v844_v14 }
 0x151   : > { %883 = vst.msk [vmem:[%s1569_s16 + $0x8] sm:$0xff] %vm276_vm0, %v845_v7 }
 0x168   : > { %v847_v5 = vpop.f32.mrf.mxu1 }
 0x169   : > { %v848_v56 = vadd.f32 %v1066_v20, %v847_v5 }
 0x16b   : > { %884 = vst.msk [vmem:[%s1569_s16 + $0x10] sm:$0xff] %vm276_vm0, %v848_v56 }
 0x170   : > { %v849_v31 = vpop.f32.mrf.mxu1 }
 0x171   : > { %v850_v22 = vadd.f32 %v1066_v20, %v849_v31 }
 0x173   : > { %885 = vst.msk [vmem:[%s1569_s16 + $0x18] sm:$0xff] %vm276_vm0, %v850_v22 }
 0x178   : > { %v852_v9 = vpop.f32.mrf.mxu1 }
 0x179   : > { %v853_v28 = vadd.f32 %v1066_v20, %v852_v9 }
 0x17b   : > { %886 = vst.msk [vmem:[%s1569_s16 + $0x20] sm:$0xff] %vm276_vm0, %v853_v28 }
 0x180   : > { %v854_v45 = vpop.f32.mrf.mxu1 }
 0x181   : > { %v855_v23 = vadd.f32 %v1066_v20, %v854_v45 }
 0x183   : > { %887 = vst.msk [vmem:[%s1569_s16 + $0x28] sm:$0xff] %vm276_vm0, %v855_v23 }
 0x188   : > { %v857_v54 = vpop.f32.mrf.mxu1 }
 0x189   : > { %v858_v44 = vadd.f32 %v1066_v20, %v857_v54 }
 0x18b   : > { %888 = vst.msk [vmem:[%s1569_s16 + $0x30] sm:$0xff] %vm276_vm0, %v858_v44 }
 0x18f   : > { %v862_v18 = vpop.f32.mrf.mxu2 }
 0x190   : > { %v863_v60 = vadd.f32 %v1066_v20, %v862_v18  ;;  %v859_v52 = vpop.f32.mrf.mxu1 }
 0x191   : > { %v860_v2 = vadd.f32 %v1066_v20, %v859_v52 }
 0x192   : > { %890 = vst.msk [vmem:[%s1569_s16 + $0x40] sm:$0xff] %vm276_vm0, %v863_v60 }
 0x193   : > { %889 = vst.msk [vmem:[%s1569_s16 + $0x38] sm:$0xff] %vm276_vm0, %v860_v2 }
 0x197   : > { %v864_v26 = vpop.f32.mrf.mxu2 }
 0x198   : > { %v865_v36 = vadd.f32 %v1066_v20, %v864_v26 }
 0x19a   : > { %891 = vst.msk [vmem:[%s1569_s16 + $0x48] sm:$0xff] %vm276_vm0, %v865_v36 }
 0x19f   : > { %v867_v33 = vpop.f32.mrf.mxu2 }
 0x1a0   : > { %v868_v62 = vadd.f32 %v1066_v20, %v867_v33 }
 0x1a2   : > { %892 = vst.msk [vmem:[%s1569_s16 + $0x50] sm:$0xff] %vm276_vm0, %v868_v62 }
 0x1a7   : > { %v869_v47 = vpop.f32.mrf.mxu2 }
 0x1a8   : > { %v870_v39 = vadd.f32 %v1066_v20, %v869_v47 }
 0x1aa   : > { %893 = vst.msk [vmem:[%s1569_s16 + $0x58] sm:$0xff] %vm276_vm0, %v870_v39 }
 0x1af   : > { %v872_v17 = vpop.f32.mrf.mxu2 }
 0x1b0   : > { %v873_v42 = vadd.f32 %v1066_v20, %v872_v17 }
 0x1b2   : > { %894 = vst.msk [vmem:[%s1569_s16 + $0x60] sm:$0xff] %vm276_vm0, %v873_v42 }
 0x1b7   : > { %v874_v63 = vpop.f32.mrf.mxu2 }
 0x1b8   : > { %v875_v10 = vadd.f32 %v1066_v20, %v874_v63 }
 0x1ba   : > { %895 = vst.msk [vmem:[%s1569_s16 + $0x68] sm:$0xff] %vm276_vm0, %v875_v10 }
 0x1bf   : > { %v877_v46 = vpop.f32.mrf.mxu2 }
 0x1c0   : > { %v878_v8 = vadd.f32 %v1066_v20, %v877_v46 }
 0x1c2   : > { %896 = vst.msk [vmem:[%s1569_s16 + $0x70] sm:$0xff] %vm276_vm0, %v878_v8 }
 0x1c7   : > { %v879_v53 = vpop.f32.mrf.mxu2 }
 0x1c8   : > { %v880_v32 = vadd.f32 %v1066_v20, %v879_v53 }
 0x1ca   : > { %897 = vst.msk [vmem:[%s1569_s16 + $0x78] sm:$0xff] %vm276_vm0, %v880_v32 }
 0x1cb PF: > { %s14_s15 = sadd.s32 1, %s1137_s15  }
 0x1cc   : > { %p11_p4 = scmp.ge.s32.totalorder %s14_s15, 6  }
 0x1ce   :  { %13 = sbr.rel (!%p11_p4) target bundleno = 1 (0x1), region = 66 }

</bundles_post_ra>
